<compile_context>
chip_gen: v7x
topology: tpu7x:2x2x1
jax: 0.10.0
libtpu: 0.0.40
codegen_flags: <defaults>
</compile_context>

<pallas_src>
import functools

import numpy as np
import jax
import jax.numpy as jnp
from jax.experimental import pallas as pl
from jax.experimental.pallas import tpu as pltpu

IMAGENET_MEAN = (0.485, 0.456, 0.406)
IMAGENET_STD = (0.229, 0.224, 0.225)

_MIB = 1024 * 1024


# ------------------------- host-side (glue) size logic -------------------------

def _constrain_to_multiple_of(x, multiple_of, min_val=0, max_val=None):
    y = int(round(x / multiple_of) * multiple_of)
    if max_val is not None and y > max_val:
        y = int(np.floor(x / multiple_of) * multiple_of)
    if y < min_val:
        y = int(np.ceil(x / multiple_of) * multiple_of)
    return y


def get_resize_size(width, height, target_w, target_h, keep_aspect_ratio=True,
                    multiple_of=14, resize_method='minimal'):
    """Re-implements Resize.get_size (host-side scalar math, no tensors)."""
    scale_height = target_h / height
    scale_width = target_w / width
    if keep_aspect_ratio:
        if resize_method == 'lower_bound':
            if scale_width > scale_height:
                scale_height = scale_width
            else:
                scale_width = scale_height
        elif resize_method == 'upper_bound':
            if scale_width < scale_height:
                scale_height = scale_width
            else:
                scale_width = scale_height
        elif resize_method == 'minimal':
            if abs(1 - scale_width) < abs(1 - scale_height):
                scale_height = scale_width
            else:
                scale_width = scale_height
        else:
            raise ValueError(f'resize_method {resize_method} not implemented')
    if resize_method == 'lower_bound':
        new_height = _constrain_to_multiple_of(scale_height * height, multiple_of, min_val=target_h)
        new_width = _constrain_to_multiple_of(scale_width * width, multiple_of, min_val=target_w)
    elif resize_method == 'upper_bound':
        new_height = _constrain_to_multiple_of(scale_height * height, multiple_of, max_val=target_h)
        new_width = _constrain_to_multiple_of(scale_width * width, multiple_of, max_val=target_w)
    elif resize_method == 'minimal':
        new_height = _constrain_to_multiple_of(scale_height * height, multiple_of)
        new_width = _constrain_to_multiple_of(scale_width * width, multiple_of)
    else:
        raise ValueError(f'resize_method {resize_method} not implemented')
    return new_width, new_height


def bilinear_matrix(out_size, in_size):
    """(out_size, in_size) row-stochastic matrix for bilinear resize, align_corners=True."""
    W = np.zeros((out_size, in_size), dtype=np.float32)
    if out_size == 1:
        W[0, 0] = 1.0
        return W
    for i in range(out_size):
        src = i * (in_size - 1) / (out_size - 1)
        i0 = min(int(np.floor(src)), in_size - 1)
        i1 = min(i0 + 1, in_size - 1)
        w1 = src - i0
        W[i, i0] += 1.0 - w1
        W[i, i1] += w1
    return W


def _vmem_budget_and_limit():
    """Generation-aware (sizing budget, vmem_limit_bytes)."""
    cap = None
    try:
        info = pltpu.get_tpu_info()
        for attr in ("vmem_capacity_bytes", "vmem_bytes", "vmem_size_bytes"):
            v = getattr(info, attr, None)
            if v:
                cap = int(v)
                break
    except Exception:
        cap = None
    if cap is None:
        cap = 64 * _MIB                       # conservative: assume v7x-sized VMEM
    if cap >= 96 * _MIB:                      # v5e / v6e: 128 MiB physical VMEM
        return 88 * _MIB, 100 * _MIB
    # v7x (64 MiB physical) or unknown small parts
    return min(32 * _MIB, cap // 2), min(48 * _MIB, (cap * 3) // 4)


def _choose_tiling(nslabs, h_in, w_in, h_out, w_out, itm_in, itm_out, budget):
    """Pick (#slabs per grid step B, #output-row tiles nt, rows per tile th).

    Prefers nt=1 with the largest divisor-of-nslabs B that fits the VMEM budget.
    Among fitting B, prefers an even grid (v7x: 2 TensorCores share the parallel
    axis), then any grid >= 2, then the largest B.  If even B=1 does not fit,
    falls back to B=1 plus 8-row-aligned output-row tiling (graceful degradation
    for large images instead of a VMEM blow-up).
    """
    def step_bytes(b, th):
        slab_tmp = (h_in * w_in * 2                    # bf16 copy of one input slab
                    + th * max(w_in, w_out) * 6        # f32 + bf16 intermediate
                    + th * w_out * 4)                  # f32 result before store
        return (2 * b * h_in * w_in * itm_in           # double-buffered input block
                + 2 * b * th * w_out * itm_out         # double-buffered output block
                + 4 * (th * h_in + w_in * w_out)       # bf16 weights (double-buffered)
                + 2 * slab_tmp)                        # ~2 unrolled iterations in flight

    candidates = []
    for b in range(1, nslabs + 1):
        if nslabs % b:
            continue
        if step_bytes(b, h_out) > budget:
            continue
        g = nslabs // b
        candidates.append((g % 2 == 0 and g >= 2, g >= 2, b))
    if candidates:
        _, _, b = max(candidates)
        return b, 1, h_out

    max_nt = max(2, -(-h_out // 8))
    for nt in range(2, max_nt + 1):
        rows = -(-h_out // nt)                 # ceil(h_out / nt)
        th = -(-rows // 8) * 8                 # round up to a multiple of 8
        if step_bytes(1, th) <= budget:
            return 1, nt, th
    return 1, max_nt, 8


# ------------------------------- Pallas kernel ---------------------------------

def _prep_kernel(x_ref, wh_ref, wct_ref, o_ref, *, bsz, num_channels, h_first,
                 apply_affine, scale_consts, offset_consts, compute_dtype):
    """One grid step = `bsz` (n, c) slabs x one tile of output rows.

    x_ref:   (bsz, H_in, W_in)   input slabs
    wh_ref:  (TH,  H_in)         row-interp rows for this output-row tile (compute_dtype)
    wct_ref: (W_in, W_out)       col-interp matrix, pre-transposed (compute_dtype)
    o_ref:   (bsz, TH, W_out)
    """
    cdt = compute_dtype
    wh = wh_ref[...]
    wct = wct_ref[...]
    for i in range(bsz):                                        # static unroll
        xi = x_ref[i].astype(cdt)                               # (H_in, W_in)
        if h_first:
            t = jnp.dot(wh, xi, preferred_element_type=jnp.float32).astype(cdt)   # (TH, W_in)
            y = jnp.dot(t, wct, preferred_element_type=jnp.float32)               # (TH, W_out)
        else:
            t = jnp.dot(xi, wct, preferred_element_type=jnp.float32).astype(cdt)  # (H_in, W_out)
            y = jnp.dot(wh, t, preferred_element_type=jnp.float32)                # (TH, W_out)
        if apply_affine:
            # Normalize folded into one affine pass: (resize(x) - mean) / std.
            if bsz % num_channels == 0:
                # channel index is static within the block -> pure constants
                s = scale_consts[i % num_channels]
                b = offset_consts[i % num_channels]
            else:
                c = (pl.program_id(0) * bsz + i) % num_channels
                s = jnp.float32(scale_consts[num_channels - 1])
                b = jnp.float32(offset_consts[num_channels - 1])
                for cc in range(num_channels - 1):
                    s = jnp.where(c == cc, jnp.float32(scale_consts[cc]), s)
                    b = jnp.where(c == cc, jnp.float32(offset_consts[cc]), b)
            y = y * s + b
        # denorm=True case: denormalize/Normalize cancel exactly (row-stochastic
        # interpolation weights), so y is already the final result.
        o_ref[i] = y.astype(o_ref.dtype)


# ------------------------------- wrapper ----------------------------------------

def depth_core_prep(x, *, img_size=(384, 384), keep_aspect_ratio=True,
                    denorm=False, do_resize=True, out_dtype=None,
                    compute_dtype=jnp.bfloat16):
    """PrepForDepthAnything (+ optional denormalize) executed in a Pallas kernel.

    out_dtype: output dtype (defaults to x.dtype); pass bf16 on HBM-bound v6e if
               the downstream ViT accepts it.
    compute_dtype: MXU operand dtype (bf16 default; f32 if the ~0.4% bf16
               interpolation error matters for the backbone).
    """
    N, C, H, W = x.shape
    net_h, net_w = img_size
    if do_resize:
        new_w, new_h = get_resize_size(W, H, net_w, net_h,
                                       keep_aspect_ratio=keep_aspect_ratio,
                                       multiple_of=14, resize_method='minimal')
    else:
        new_w, new_h = W, H

    apply_affine = not denorm
    if apply_affine and C != len(IMAGENET_MEAN):
        raise ValueError("ImageNet normalization expects 3 channels")

    out_dt = np.dtype(x.dtype) if out_dtype is None else np.dtype(out_dtype)
    itm_in = np.dtype(x.dtype).itemsize
    itm_out = out_dt.itemsize

    budget, vmem_limit = _vmem_budget_and_limit()
    NC = N * C
    B, nt, th = _choose_tiling(NC, H, W, new_h, new_w, itm_in, itm_out, budget)
    h_total = nt * th

    # Static matmul-order choice by per-slab FLOPs (row-tiling forces h-first so the
    # col-resize only runs on the tile's rows).
    cost_h_first = h_total * H * W + h_total * W * new_w
    cost_w_first = H * W * new_w + h_total * H * new_w
    h_first = True if nt > 1 else (cost_h_first <= cost_w_first)

    wh_np = np.zeros((h_total, H), dtype=np.float32)
    wh_np[:new_h] = bilinear_matrix(new_h, H)                   # zero rows only in fallback
    wct_np = np.ascontiguousarray(bilinear_matrix(new_w, W).T)  # (W_in, W_out), exact width
    wh = jnp.asarray(wh_np, dtype=compute_dtype)
    wct = jnp.asarray(wct_np, dtype=compute_dtype)

    if apply_affine:
        scale_c = tuple(float(1.0 / s) for s in IMAGENET_STD)
        offset_c = tuple(float(-m / s) for m, s in zip(IMAGENET_MEAN, IMAGENET_STD))
    else:
        scale_c = offset_c = None

    xf = x.reshape(NC, H, W)
    kernel = functools.partial(
        _prep_kernel, bsz=B, num_channels=C, h_first=h_first,
        apply_affine=apply_affine, scale_consts=scale_c, offset_consts=offset_c,
        compute_dtype=compute_dtype)

    flops = int(2 * NC * (cost_h_first if h_first else cost_w_first))
    bytes_accessed = int(NC * H * W * itm_in + NC * h_total * new_w * itm_out
                         + 2 * (h_total * H + W * new_w))

    out = pl.pallas_call(
        kernel,
        out_shape=jax.ShapeDtypeStruct((NC, h_total, new_w), out_dt),
        grid_spec=pltpu.PrefetchScalarGridSpec(
            num_scalar_prefetch=0,
            grid=(NC // B, nt),
            in_specs=[
                pl.BlockSpec((B, H, W), lambda i, j: (i, 0, 0)),
                pl.BlockSpec((th, H), lambda i, j: (j, 0)),
                pl.BlockSpec((W, new_w), lambda i, j: (0, 0)),
            ],
            out_specs=pl.BlockSpec((B, th, new_w), lambda i, j: (i, j, 0)),
        ),
        compiler_params=pltpu.CompilerParams(
            dimension_semantics=("parallel", "parallel"),
            vmem_limit_bytes=int(vmem_limit),
        ),
        cost_estimate=pl.CostEstimate(flops=flops, transcendentals=0,
                                      bytes_accessed=bytes_accessed),
    )(xf, wh, wct)

    if h_total != new_h:
        # Only reached in the large-image row-tiled fallback (one extra output pass).
        out = out[:, :new_h, :]
    return out.reshape(N, C, new_h, new_w)


def depth_core_forward(x, *, denorm=False, img_size=(384, 384), keep_aspect_ratio=True):
    """DepthCore.forward up to the backbone call."""
    prepped = depth_core_prep(x, img_size=img_size, keep_aspect_ratio=keep_aspect_ratio,
                              denorm=denorm, do_resize=True)
    # TODO(synk): rel_depth = self.core(prepped) and hook-captured layer features
    # (DepthAnything ViT backbone) are not reimplemented here.
    return prepped


# ------------------------------------ main --------------------------------------

if __name__ == "__main__":
    key = jax.random.PRNGKey(0)
    N, C, H, W = 2, 3, 16, 16
    x = jax.random.uniform(key, (N, C, H, W), dtype=jnp.float32)

    img_size = (28, 28)  # small, multiple-of-14-friendly target
    new_w, new_h = get_resize_size(W, H, img_size[1], img_size[0], True, 14, 'minimal')

    # pure-JAX f32 reference for the prep pipeline
    wh_f = jnp.asarray(bilinear_matrix(new_h, H))
    wc_f = jnp.asarray(bilinear_matrix(new_w, W))
    mean = jnp.asarray(IMAGENET_MEAN).reshape(1, 3, 1, 1)
    std = jnp.asarray(IMAGENET_STD).reshape(1, 3, 1, 1)

    # denorm=True path: denormalize -> resize -> normalize
    out_t = jax.block_until_ready(
        depth_core_forward(x, denorm=True, img_size=img_size, keep_aspect_ratio=True))
    xd = x * std + mean
    ref_t = (jnp.einsum('oh,nchw,pw->ncop', wh_f, xd, wc_f) - mean) / std
    assert out_t.shape == (N, C, new_h, new_w), out_t.shape
    np.testing.assert_allclose(np.asarray(out_t), np.asarray(ref_t), atol=5e-2, rtol=5e-2)

    # denorm=False path: resize -> normalize
    out_f = jax.block_until_ready(
        depth_core_forward(x, denorm=False, img_size=img_size, keep_aspect_ratio=True))
    ref_f = (jnp.einsum('oh,nchw,pw->ncop', wh_f, x, wc_f) - mean) / std
    assert out_f.shape == (N, C, new_h, new_w), out_f.shape
    np.testing.assert_allclose(np.asarray(out_f), np.asarray(ref_f), atol=5e-2, rtol=5e-2)

    print("KERNEL_OK")
</pallas_src>

<mosaic_0001>
module attributes {stable_mosaic.version = 11 : i64} {
  func.func @_prep_kernel(%arg0: i32, %arg1: i32, %arg2: memref<3x16x16xf32, #tpu.memory_space<vmem>>, %arg3: memref<28x16xbf16, #tpu.memory_space<vmem>>, %arg4: memref<16x28xbf16, #tpu.memory_space<vmem>>, %arg5: memref<3x28x28xf32, #tpu.memory_space<vmem>>) attributes {dimension_semantics = [#tpu.dimension_semantics<parallel>, #tpu.dimension_semantics<parallel>], iteration_bounds = array<i64: 2, 1>, scalar_prefetch = 0 : i64, scratch_operands = 0 : i64, tpu.core_type = #tpu.core_type<tc>, window_params = [{transform_indices = @transform_0, window_bounds = array<i64: 3, 16, 16>}, {transform_indices = @transform_1, window_bounds = array<i64: 28, 16>}, {pipeline_mode = #tpu.pipeline_mode<synchronous>, transform_indices = @transform_2, window_bounds = array<i64: 16, 28>}, {transform_indices = @transform_3, window_bounds = array<i64: 3, 28, 28>}]} {
    %c0 = arith.constant 0 : index
    %c0_0 = arith.constant 0 : index
    %0 = vector.load %arg3[%c0, %c0_0] : memref<28x16xbf16, #tpu.memory_space<vmem>>, vector<28x16xbf16>
    %c0_1 = arith.constant 0 : index
    %c0_2 = arith.constant 0 : index
    %1 = vector.load %arg4[%c0_1, %c0_2] : memref<16x28xbf16, #tpu.memory_space<vmem>>, vector<16x28xbf16>
    %c0_3 = arith.constant 0 : index
    %c0_4 = arith.constant 0 : index
    %c0_5 = arith.constant 0 : index
    %2 = vector.load %arg2[%c0_3, %c0_4, %c0_5] : memref<3x16x16xf32, #tpu.memory_space<vmem>>, vector<1x16x16xf32>
    %3 = vector.shape_cast %2 : vector<1x16x16xf32> to vector<16x16xf32>
    %4 = arith.truncf %3 : vector<16x16xf32> to vector<16x16xbf16>
    %cst = arith.constant dense<0.000000e+00> : vector<28x16xf32>
    %5 = tpu.matmul %0, %4, %cst {dimension_numbers = #tpu.dot_dimension_numbers<[1], [0], [0], [1], [0, 0, 1, 1], [], []>} : vector<28x16xbf16>, vector<16x16xbf16>, vector<28x16xf32> -> vector<28x16xf32>
    %6 = arith.truncf %5 : vector<28x16xf32> to vector<28x16xbf16>
    %cst_6 = arith.constant dense<0.000000e+00> : vector<28x28xf32>
    %7 = tpu.matmul %6, %1, %cst_6 {dimension_numbers = #tpu.dot_dimension_numbers<[1], [0], [0], [1], [0, 0, 1, 1], [], []>} : vector<28x16xbf16>, vector<16x28xbf16>, vector<28x28xf32> -> vector<28x28xf32>
    %c0_7 = arith.constant 0 : index
    %c0_8 = arith.constant 0 : index
    %c0_9 = arith.constant 0 : index
    %8 = vector.load %arg5[%c0_7, %c0_8, %c0_9] : memref<3x28x28xf32, #tpu.memory_space<vmem>>, vector<1x28x28xf32>
    %9 = vector.shape_cast %8 : vector<1x28x28xf32> to vector<28x28xf32>
    %10 = vector.shape_cast %7 : vector<28x28xf32> to vector<1x28x28xf32>
    tpu.vector_store %arg5[%c0_7, %c0_8, %c0_9], %10 {strides = array<i32>} : memref<3x28x28xf32, #tpu.memory_space<vmem>>, vector<1x28x28xf32>,
    %c1 = arith.constant 1 : index
    %c0_10 = arith.constant 0 : index
    %c0_11 = arith.constant 0 : index
    %11 = vector.load %arg2[%c1, %c0_10, %c0_11] : memref<3x16x16xf32, #tpu.memory_space<vmem>>, vector<1x16x16xf32>
    %12 = vector.shape_cast %11 : vector<1x16x16xf32> to vector<16x16xf32>
    %13 = arith.truncf %12 : vector<16x16xf32> to vector<16x16xbf16>
    %cst_12 = arith.constant dense<0.000000e+00> : vector<28x16xf32>
    %14 = tpu.matmul %0, %13, %cst_12 {dimension_numbers = #tpu.dot_dimension_numbers<[1], [0], [0], [1], [0, 0, 1, 1], [], []>} : vector<28x16xbf16>, vector<16x16xbf16>, vector<28x16xf32> -> vector<28x16xf32>
    %15 = arith.truncf %14 : vector<28x16xf32> to vector<28x16xbf16>
    %cst_13 = arith.constant dense<0.000000e+00> : vector<28x28xf32>
    %16 = tpu.matmul %15, %1, %cst_13 {dimension_numbers = #tpu.dot_dimension_numbers<[1], [0], [0], [1], [0, 0, 1, 1], [], []>} : vector<28x16xbf16>, vector<16x28xbf16>, vector<28x28xf32> -> vector<28x28xf32>
    %c1_14 = arith.constant 1 : index
    %c0_15 = arith.constant 0 : index
    %c0_16 = arith.constant 0 : index
    %17 = vector.load %arg5[%c1_14, %c0_15, %c0_16] : memref<3x28x28xf32, #tpu.memory_space<vmem>>, vector<1x28x28xf32>
    %18 = vector.shape_cast %17 : vector<1x28x28xf32> to vector<28x28xf32>
    %19 = vector.shape_cast %16 : vector<28x28xf32> to vector<1x28x28xf32>
    tpu.vector_store %arg5[%c1_14, %c0_15, %c0_16], %19 {strides = array<i32>} : memref<3x28x28xf32, #tpu.memory_space<vmem>>, vector<1x28x28xf32>,
    %c2 = arith.constant 2 : index
    %c0_17 = arith.constant 0 : index
    %c0_18 = arith.constant 0 : index
    %20 = vector.load %arg2[%c2, %c0_17, %c0_18] : memref<3x16x16xf32, #tpu.memory_space<vmem>>, vector<1x16x16xf32>
    %21 = vector.shape_cast %20 : vector<1x16x16xf32> to vector<16x16xf32>
    %22 = arith.truncf %21 : vector<16x16xf32> to vector<16x16xbf16>
    %cst_19 = arith.constant dense<0.000000e+00> : vector<28x16xf32>
    %23 = tpu.matmul %0, %22, %cst_19 {dimension_numbers = #tpu.dot_dimension_numbers<[1], [0], [0], [1], [0, 0, 1, 1], [], []>} : vector<28x16xbf16>, vector<16x16xbf16>, vector<28x16xf32> -> vector<28x16xf32>
    %24 = arith.truncf %23 : vector<28x16xf32> to vector<28x16xbf16>
    %cst_20 = arith.constant dense<0.000000e+00> : vector<28x28xf32>
    %25 = tpu.matmul %24, %1, %cst_20 {dimension_numbers = #tpu.dot_dimension_numbers<[1], [0], [0], [1], [0, 0, 1, 1], [], []>} : vector<28x16xbf16>, vector<16x28xbf16>, vector<28x28xf32> -> vector<28x28xf32>
    %c2_21 = arith.constant 2 : index
    %c0_22 = arith.constant 0 : index
    %c0_23 = arith.constant 0 : index
    %26 = vector.load %arg5[%c2_21, %c0_22, %c0_23] : memref<3x28x28xf32, #tpu.memory_space<vmem>>, vector<1x28x28xf32>
    %27 = vector.shape_cast %26 : vector<1x28x28xf32> to vector<28x28xf32>
    %28 = vector.shape_cast %25 : vector<28x28xf32> to vector<1x28x28xf32>
    tpu.vector_store %arg5[%c2_21, %c0_22, %c0_23], %28 {strides = array<i32>} : memref<3x28x28xf32, #tpu.memory_space<vmem>>, vector<1x28x28xf32>,
    return
  }
  func.func @transform_0(%arg0: i32, %arg1: i32) -> (i32, i32, i32) {
    %c0_i32 = arith.constant 0 : i32
    %c0_i32_0 = arith.constant 0 : i32
    %c0_i32_1 = arith.constant 0 : i32
    return %arg0, %c0_i32, %c0_i32_0 : i32, i32, i32
  }
  func.func @transform_1(%arg0: i32, %arg1: i32) -> (i32, i32) {
    %c0_i32 = arith.constant 0 : i32
    %c0_i32_0 = arith.constant 0 : i32
    return %arg1, %c0_i32 : i32, i32
  }
  func.func @transform_2(%arg0: i32, %arg1: i32) -> (i32, i32) {
    %c0_i32 = arith.constant 0 : i32
    %c0_i32_0 = arith.constant 0 : i32
    %c0_i32_1 = arith.constant 0 : i32
    return %c0_i32, %c0_i32_0 : i32, i32
  }
  func.func @transform_3(%arg0: i32, %arg1: i32) -> (i32, i32, i32) {
    %c0_i32 = arith.constant 0 : i32
    %c0_i32_0 = arith.constant 0 : i32
    return %arg0, %arg1, %c0_i32 : i32, i32, i32
  }
}

</mosaic_0001>

<bundles_post_ra>
// kernel: tpu_custom_call.1
= control target key start
LH: loop header
LB: loop body
LE: loop exit
PB: predicated region body
PF: predicated region fallthrough
CT: control target
= control target key end

     0   :  { %8 = vsyncpa [#allocation3], 0  ;;  %s1240_s0 = inlined_call_operand.hbm [shape: f32[6,16,16], index: 0, kind: input, shape index: {}]   ;;  %s1241_s1 = inlined_call_operand.vmem [shape: bf16[28,16], index: 1, kind: input, shape index: {}]   ;;  %s1242_s2 = inlined_call_operand.vmem [shape: bf16[16,28], index: 2, kind: input, shape index: {}]   ;;  %s1243_s3 = inlined_call_operand.hbm [shape: f32[6,28,28], index: 3, kind: output, shape index: {}]  }
   0x1   :  { %10 = vsyncpa [#allocation3 + $0x1], 0 }
   0x2   :  { %11 = vsyncpa [#allocation4], 0 }
   0x3   :  { %13 = vsyncpa [#allocation4 + $0x1], 0  ;;  %s1031_s12 = smov 0   ;;  %s1033_s13 = smov 0  }
   0x4   :  { %s1035_s14 = smov 0   ;;  %s1037_s15 = smov 0  }
   0x5   :  { %s1039_s16 = smov 0   ;;  %s1041_s17 = smov 0  }
   0x6 LB: > { %s720_s18 = sadd.s32 4294967295, %s1003_s17   ;;  %s721_s19 = sadd.s32 4294967294, %s1003_s17   ;;  %s1003_s17 = sphi %s1041_s17, %s19_s17   ;;  %s999_s16 = sphi %s1039_s16, %s1258_s16   ;;  %s995_s15 = sphi %s1037_s15, %s1257_s15   ;;  %s991_s14 = sphi %s1035_s14, %s1256_s14   ;;  %s987_s13 = sphi %s1033_s13, %s1255_s13   ;;  %s983_s12 = sphi %s1031_s12, %s1254_s12  }
   0x7   : > { %s31_s20 = sadd.s32 1, %s999_s16  ;;  %s38_s21 = sadd.s32 1, %s991_s14 }
   0x8   : > { %p33_p0 = scmp.ge.s32.totalorder %s31_s20, 2  ;;  %p45_p1 = scmp.ne.s32.totalorder %s991_s14, %s987_s13 }
   0x9   : > { %p46_p2 = scmp.eq.s32.totalorder %s1003_s17, 0  ;;  %p51_p3 = scmp.ne.s32.totalorder %s987_s13, %s983_s12 }
   0xa   : > { %s1260_s20 = smov (%p33_p0, %s31_s20), 0  ;;  %p52_p5 = scmp.eq.s32.totalorder %s720_s18, 0 }
   0xb   : > { %p1072_p4 = por %p46_p2, %p45_p1  ;;  %s35_s23 = ssub.s32 %s999_s16, %s1260_s20 }
   0xc   : > { %p124_p6 = scmp.eq.s32.totalorder %s720_s18, 1  ;;  %p36_p7 = scmp.eq.s32.totalorder %s35_s23, 0 }
   0xd   : > { %p1078_p8 = por %p52_p5, %p51_p3  ;;  %p130_p10 = scmp.eq.s32.totalorder %s721_s19, 1 }
   0xe   : > { %p1082_p9 = por %p124_p6, %p45_p1  ;;  %p834_p13 = scmp.lt.s32.totalorder %s1003_s17, 2 }
   0xf   : > { %s1087_s26 = scalar_select %p36_p7, %s991_s14, %s38_s21  }
  0x10   : > { %s1247_s25 = scalar_select %p1082_p9, 1, 0 }
  0x11   : > { %p1089_p11 = por %p130_p10, %p51_p3  ;;  %s162_s28 = sand.u32 1, %s991_s14  }
  0x12   : > { %s819_s29 = smul.u32 48, %s162_s28  ;;  %p1099_p0 = pnand %p834_p13, %p1072_p4 }
  0x13   : > { %s1248_s27 = scalar_select %p1089_p11, 1, 0 }
  0x14   : > { %s763_s30 = smul.u32 768, %s999_s16  ;;  %s166_s8 = scalar_lea.vmem [#allocation2], %s819_s29 }
  0x15   : > { %s174_s9 = sshll.u32 %s166_s8, 4  ;;  %s1111_s10 = scalar_lea.sflag [#allocation3], %s162_s28  ;;  %s1108_s9 = int_to_ptr.vmem [resolvable:$true] %s174_s9 }
  0x16   : > { %s1106_s7 = scalar_lea.hbm %s1240_s0, %s763_s30  ;;  %p893_p3 = pneg %p1099_p0 }
  0x17   : > { %s891_s11 = scalar_lea.hbm %s1106_s7, 768  ;;  %s896_s21 = scalar_lea.hbm %s1240_s0, 1536 }
  0x18   : > { %p892_p2 = scmp.ne.s32.totalorder %s1106_s7, %s891_s11  ;;  %p897_p6 = scmp.lt.u32.totalorder %s1106_s7, %s1240_s0 }
  0x19   : > { %p898_p7 = scmp.lt.u32.totalorder %s896_s21, %s891_s11  ;;  %p900_p13 = scmp.lt.u32.totalorder %s891_s11, %s1106_s7 }
  0x1a   : > { %p894_p4 = pnand %p893_p3, %p892_p2 }
  0x1b   : > { %p899_p10 = por %p898_p7, %p897_p6 }
  0x1c   : > { %p895_p5 = pneg %p894_p4 }
  0x1d   : > { %p901_p12 = por %p900_p13, %p899_p10 }
  0x1f   : > { %p902_p1 = pnand %p901_p12, %p895_p5 }
  0x21   : > { %905 = shalt.err (!%p902_p1)
}
  0x22   : > { %s906_s28 = scalar_lea.vmem %s1108_s9, 768  ;;  %s1005_s29 = smov [#allocation2]  }
  0x23   : > { %p907_p2 = scmp.ne.s32.totalorder %s1108_s9, %s906_s28  ;;  %s911_s30 = sshll.u32 %s1005_s29, 4  ;;  %s912_s30 = int_to_ptr.vmem [resolvable:$false] %s911_s30 }
  0x24   : > { %s913_s5 = scalar_lea.vmem %s912_s30, 1536  ;;  %p914_p9 = scmp.lt.s32.totalorder %s1108_s9, %s912_s30 }
  0x25   : > { %p909_p4 = pnand %p907_p2, %p893_p3  ;;  %p915_p6 = scmp.lt.s32.totalorder %s913_s5, %s906_s28 }
  0x27   : > { %p910_p11 = pneg %p909_p4  ;;  %p916_p7 = por %p915_p6, %p914_p9 }
  0x29   : > { %p917_p10 = pnand %p916_p7, %p910_p11 }
  0x2b   : > { %920 = shalt.err (!%p917_p10)
}
  0x2c   : > { %s1006_s6 = smov 128   ;;  %s1007_s8 = smov 8  }
  0x2d   : > { %829 = dma.hbm_to_vmem [thread:$0]  (!%p1099_p0), %s1106_s7, 768, %s1108_s9, %s1111_s10, %s1006_s6, %s1006_s6, %s1007_s8  }
  0x2e   : > { %p182_p12 = scmp.lt.s32.totalorder %s1003_s17, 3  ;;  %p1250_p1 = scmp.ge.s32.totalorder %s1003_s17, 1 }
  0x30   : > { %p183_p3 = pnand %p1250_p1, %p182_p12 }
  0x31   : > { %s1143_s11 = sand.u32 (!%p183_p3), 1, %s987_s13  }
  0x32   : > { %186 = sbr.rel (%p183_p3) target bundleno = 529 (0x211), region = 32  ;;  %s189_s19 = scalar_lea.sflag (!%p183_p3), [#allocation3], %s1143_s11 }
  0x33   : > { %s820_s18 = smul.u32 (!%p183_p3), 48, %s1143_s11 }
  0x35   : > { %s192_s21 = scalar_lea.vmem (!%p183_p3), [#allocation2], %s820_s18 }
  0x39   : > { %974 = dma.done.wait (%p1078_p8), %s189_s19, 768  }
  0x3a   : > { %976 = vsyncadd (%p1078_p8), %s189_s19, 4294966528  ;;  %v236_v0 = vld [vmem:[%s192_s21] sm:$0xff]  ;;  %v237_v1 = vld [vmem:[%s192_s21 + $0x8] sm:$0xff]  ;;  %vm249_vm0 = vcmask 130048   ;;  %s821_s23 = smul.u32 96, %s1143_s11  ;;  %vm368_vm1 = vcmask 228352  }
  0x3b   : > { %v238_v2 = vpack.c.bf16 %v237_v1, %v236_v0  ;;  %v888_v3 = vld [vmem:[%s1241_s1] sm:$0xff]   ;;  %v889_v4 = vld [vmem:[%s1241_s1 + $0x8] sm:$0x3f]   ;;  %vm372_vm2 = vcmask 224256   ;;  %s764_s29 = smul.u32 1536, %s995_s15  ;;  %s605_s15 = scalar_lea.sflag [#allocation4], %s1143_s11 }
  0x3c   : > { %v735_v5 = vld [vmem:[%s192_s21 + $0x10] sm:$0xff]  ;;  %785 = vmatprep.mubr.msk.bf16.mxu0 %vm249_vm0, %v888_v3  ;;  %v736_v6 = vld [vmem:[%s192_s21 + $0x18] sm:$0xff]  ;;  %v745_v7 = vld [vmem:[%s192_s21 + $0x20] sm:$0xff]  ;;  %s219_s28 = scalar_lea.vmem [#allocation5], %s821_s23  ;;  %p1251_p9 = scmp.ne.s32.totalorder %s1247_s25, 0 }
  0x3d   : > { %783 = vmatprep.subr.bf16.mxu0 %v238_v2  ;;  %v746_v8 = vld [vmem:[%s192_s21 + $0x28] sm:$0xff]  ;;  %v377_v9 = vpack.c.bf16 %v736_v6, %v735_v5  ;;  %v890_v11 = vld [vmem:[%s1242_s2] sm:$0xff]   ;;  %s621_s30 = sshll.u32 %s219_s28, 4  ;;  %s1186_s8 = scalar_lea.hbm %s1243_s3, %s764_s29  ;;  %s1188_s30 = int_to_ptr.vmem [resolvable:$true] %s621_s30 }
  0x3e   : > { %784 = vmatpush3.bf16.msra.mxu0 %v238_v2  ;;  %v492_v10 = vpack.c.bf16 %v746_v8, %v745_v7  ;;  %789 = vmatprep.subr.bf16.mxu1 %v890_v11  ;;  %s921_s18 = scalar_lea.vmem %s1188_s30, 1536  ;;  %s1008_s19 = smov [#allocation5]  }
  0x3f   : > { %795 = vmatprep.subr.bf16.mxu0 %v377_v9  ;;  %790 = vmatpush3.bf16.msra.mxu1 %v890_v11  ;;  %p922_p8 = scmp.ne.s32.totalorder %s1188_s30, %s921_s18  ;;  %s925_s21 = sshll.u32 %s1008_s19, 4  ;;  %s926_s21 = int_to_ptr.vmem [resolvable:$false] %s925_s21 }
  0x40   : > { %801 = vmatprep.subr.bf16.mxu1 %v890_v11  ;;  %s927_s4 = scalar_lea.vmem %s926_s21, 3072  ;;  %p928_p5 = scmp.lt.s32.totalorder %s1188_s30, %s926_s21 }
  0x41   : > { %786 = vmatmul.mubr.msk.bf16.vlgmr.msra.gmra.mrb[0].mxu0 %vm249_vm0, %v889_v4  ;;  %p923_p11 = pnand %p922_p8, %p1251_p9  ;;  %p929_p13 = scmp.lt.s32.totalorder %s927_s4, %s921_s18 }
  0x42   : > { %796 = vmatpush3.bf16.msra.mxu0 %v377_v9  ;;  %797 = vmatprep.mubr.msk.bf16.mxu0 %vm249_vm0, %v888_v3 }
  0x43   : > { %807 = vmatprep.subr.bf16.mxu0 %v492_v10  ;;  %p924_p0 = pneg %p923_p11  ;;  %p930_p2 = por %p929_p13, %p928_p5 }
  0x45   : > { %p931_p4 = pnand %p930_p2, %p924_p0 }
  0x49   : > { %798 = vmatmul.mubr.msk.bf16.vlgmr.msra.gmra.mrb[4].mxu0 %vm249_vm0, %v889_v4 }
  0x4a   : > { %808 = vmatpush3.bf16.msra.mxu0 %v492_v10  ;;  %809 = vmatprep.mubr.msk.bf16.mxu0 %vm249_vm0, %v888_v3 }
  0x51   : > { %810 = vmatmul.mubr.msk.bf16.vlgmr.msra.gmra.mrb[8].mxu0 %vm249_vm0, %v889_v4 }
 0x114   : > { %v787_v12 = vpop.f32.mrb[0].mxu0 }
 0x115   : > { %v290_v13 = vpop.f32.mrb[1].mxu0 }
 0x116   : > { %v788_v14 = vpop.f32.mrb[2].mxu0 }
 0x117   : > { %v306_v15 = vpack.c.bf16 %v788_v14, %v787_v12  ;;  %v293_v16 = vpop.f32.mrb[3].mxu0 }
 0x118   : > { %v305_v17 = vpack.c.bf16 %v293_v16, %v290_v13 }
 0x11a   : > { %791 = vmatprep.mubr.msk.bf16.mxu1 %vm249_vm0, %v305_v17 }
 0x11b   : > { %792 = vmatmul.mubr.msk.bf16.vlgmr.msra.gmra.mrb[0].mxu1 %vm249_vm0, %v306_v15 }
 0x11c   : > { %v799_v18 = vpop.f32.mrb[4].mxu0  ;;  %802 = vmatpush3.bf16.msra.mxu1 %v890_v11 }
 0x11d   : > { %v412_v19 = vpop.f32.mrb[5].mxu0  ;;  %813 = vmatprep.subr.bf16.mxu1 %v890_v11 }
 0x11e   : > { %v800_v20 = vpop.f32.mrb[6].mxu0 }
 0x11f   : > { %v428_v21 = vpack.c.bf16 %v800_v20, %v799_v18  ;;  %v415_v22 = vpop.f32.mrb[7].mxu0 }
 0x120   : > { %v427_v23 = vpack.c.bf16 %v415_v22, %v412_v19 }
 0x122   : > { %803 = vmatprep.mubr.msk.bf16.mxu1 %vm249_vm0, %v427_v23 }
 0x123   : > { %804 = vmatmul.mubr.msk.bf16.vlgmr.msra.gmra.mrb[4].mxu1 %vm249_vm0, %v428_v21 }
 0x124   : > { %v811_v24 = vpop.f32.mrb[8].mxu0  ;;  %814 = vmatpush3.bf16.msra.mxu1 %v890_v11 }
 0x125   : > { %v527_v25 = vpop.f32.mrb[9].mxu0 }
 0x126   : > { %v812_v26 = vpop.f32.mrb[10].mxu0 }
 0x127   : > { %v543_v27 = vpack.c.bf16 %v812_v26, %v811_v24  ;;  %v530_v28 = vpop.f32.mrb[11].mxu0 }
 0x128   : > { %v542_v29 = vpack.c.bf16 %v530_v28, %v527_v25 }
 0x12a   : > { %815 = vmatprep.mubr.msk.bf16.mxu1 %vm249_vm0, %v542_v29 }
 0x12b   : > { %816 = vmatmul.mubr.msk.bf16.vlgmr.msra.gmra.mrb[8].mxu1 %vm249_vm0, %v543_v27 }
 0x1ee   : > { %v793_v30 = vpop.f32.mrb[0].mxu1 }
 0x1ef   : > { %371 = vst.msk [vmem:[%s219_s28 + $0x10] sm:$0xff] %vm368_vm1, %v793_v30  ;;  %v353_v31 = vpop.f32.mrb[1].mxu1 }
 0x1f0   : > { %369 = vst.msk [vmem:[%s219_s28] sm:$0xff] %vm368_vm1, %v353_v31  ;;  %v794_v32 = vpop.f32.mrb[2].mxu1 }
 0x1f1   : > { %373 = vst.msk [vmem:[%s219_s28 + $0x18] sm:$0xf] %vm372_vm2, %v794_v32  ;;  %v356_v33 = vpop.f32.mrb[3].mxu1 }
 0x1f2   : > { %370 = vst.msk [vmem:[%s219_s28 + $0x8] sm:$0xff] %vm368_vm1, %v356_v33 }
 0x1f6   : > { %v805_v34 = vpop.f32.mrb[4].mxu1 }
 0x1f7   : > { %743 = vst.msk [vmem:[%s219_s28 + $0x30] sm:$0xff] %vm368_vm1, %v805_v34  ;;  %v469_v35 = vpop.f32.mrb[5].mxu1 }
 0x1f8   : > { %741 = vst.msk [vmem:[%s219_s28 + $0x20] sm:$0xff] %vm368_vm1, %v469_v35  ;;  %v806_v36 = vpop.f32.mrb[6].mxu1 }
 0x1f9   : > { %744 = vst.msk [vmem:[%s219_s28 + $0x38] sm:$0xf] %vm372_vm2, %v806_v36  ;;  %v472_v37 = vpop.f32.mrb[7].mxu1 }
 0x1fa   : > { %742 = vst.msk [vmem:[%s219_s28 + $0x28] sm:$0xff] %vm368_vm1, %v472_v37 }
 0x1fe   : > { %v817_v38 = vpop.f32.mrb[8].mxu1 }
 0x1ff   : > { %753 = vst.msk [vmem:[%s219_s28 + $0x50] sm:$0xff] %vm368_vm1, %v817_v38  ;;  %v584_v39 = vpop.f32.mrb[9].mxu1 }
 0x200   : > { %751 = vst.msk [vmem:[%s219_s28 + $0x40] sm:$0xff] %vm368_vm1, %v584_v39  ;;  %v818_v40 = vpop.f32.mrb[10].mxu1 }
 0x201   : > { %754 = vst.msk [vmem:[%s219_s28 + $0x58] sm:$0xf] %vm372_vm2, %v818_v40  ;;  %v587_v41 = vpop.f32.mrb[11].mxu1 }
 0x202   : > { %752 = vst.msk [vmem:[%s219_s28 + $0x48] sm:$0xff] %vm368_vm1, %v587_v41 }
 0x203   : > { %934 = shalt.err (!%p931_p4)
}
 0x204   : > { %s935_s7 = scalar_lea.hbm %s1186_s8, 1536  ;;  %s939_s24 = scalar_lea.hbm %s1243_s3, 3072 }
 0x205   : > { %p936_p6 = scmp.ne.s32.totalorder %s1186_s8, %s935_s7  ;;  %p940_p12 = scmp.lt.u32.totalorder %s1186_s8, %s1243_s3 }
 0x206   : > { %p941_p1 = scmp.lt.u32.totalorder %s939_s24, %s935_s7  ;;  %p943_p8 = scmp.lt.u32.totalorder %s935_s7, %s1186_s8 }
 0x207   : > { %p937_p7 = pnand %p936_p6, %p1251_p9 }
 0x208   : > { %p942_p3 = por %p941_p1, %p940_p12 }
 0x209   : > { %p938_p10 = pneg %p937_p7 }
 0x20a   : > { %p944_p11 = por %p943_p8, %p942_p3 }
 0x20c   : > { %p945_p0 = pnand %p944_p11, %p938_p10 }
 0x20e   : > { %948 = shalt.err (!%p945_p0)
}
 0x20f   : > { %s1009_s28 = smov 128   ;;  %s1010_s29 = smov 8  }
 0x210   : > { %824 = dma.vmem_to_hbm [thread:$0]  (%p1251_p9), %s1188_s30, 1536, %s1186_s8, %s605_s15, %s1009_s28, %s1009_s28, %s1010_s29  }
 0x211 PF: > { %s636_s5 = sand.u32 1, %s983_s12   ;;  %p1252_p5 = scmp.ne.s32.totalorder %s1248_s27, 0 }
 0x212   : > { %p1253_p13 = scmp.ge.s32.totalorder %s1003_s17, 2  ;;  %s637_s6 = scalar_lea.sflag [#allocation4], %s636_s5 }
 0x214   : > { %p831_p2 = pnand %p1253_p13, %p1252_p5 }
 0x216   : > { %978 = dma.done.wait (!%p831_p2), %s637_s6, 1536  }
 0x217   : > { %980 = vsyncadd (!%p831_p2), %s637_s6, 4294965760  ;;  %s19_s17 = sadd.s32 1, %s1003_s17   ;;  %s1254_s12 = smov %s987_s13 }
 0x218   : > { %p16_p4 = scmp.ge.s32.totalorder %s19_s17, 4   ;;  %s1255_s13 = smov %s991_s14 }
 0x219   : > { %s1256_s14 = smov %s1087_s26  ;;  %s1257_s15 = smov %s999_s16 }
 0x21a   : > { %s1258_s16 = smov %s1260_s20  ;;  %18 = sbr.rel (!%p16_p4) target bundleno = 6 (0x6), region = 84 }
 0x221   :  { %642 = vsyncpa [#allocation3], 1 }
 0x222   :  { %644 = vsyncpa [#allocation3 + $0x1], 1 }
 0x223   :  { %645 = vsyncpa [#allocation4], 1 }
 0x224   :  { %647 = vsyncpa [#allocation4 + $0x1], 1 }

</bundles_post_ra>
